<compile_context>
chip_gen: v5e
topology: v5e:2x2
jax: 0.10.0
libtpu: 0.0.40
codegen_flags: <defaults>
</compile_context>

<pallas_src>
import functools

import jax
import jax.numpy as jnp
from jax import lax
from jax.experimental import pallas as pl
from jax.experimental.pallas import tpu as pltpu


# ---------------------------------------------------------------------------
# Kernel
# ---------------------------------------------------------------------------
def _base_mlp_kernel(x_ref, w1_ref, b1_ref, w2_ref, b2_ref, w3_ref, b3_ref,
                     is_cal_ref, out_ref):
    """Fused base-module MLP + flag-gated sigmoid for one batch tile.

    x block is (TN, D) in its natural row-major layout (batch on sublanes);
    the first contraction consumes D directly, so all activations are
    feature-major (batch on the LANE axis) and the output is a lane-dense
    (1, TN) slab.  Weights are torch-Linear layout (out_features, in_features).
    """
    x = x_ref[...].astype(jnp.bfloat16)                            # (TN, D)
    # Layer 1: contract D of W1 (H,D) with D of x (TN,D) -> (H, TN).
    # MXU, bf16 inputs, f32 accumulation; the small operand transpose is
    # handled in-VMEM by the XLU, which is otherwise idle here.
    h1 = lax.dot_general(w1_ref[...], x,
                         dimension_numbers=(((1,), (1,)), ((), ())),
                         preferred_element_type=jnp.float32)
    h1 = jnp.maximum(h1 + b1_ref[...], 0.0)                        # (H, TN) f32
    # Layer 2: cast activations to bf16 only at the MXU input.
    h2 = jnp.dot(w2_ref[...], h1.astype(jnp.bfloat16),
                 preferred_element_type=jnp.float32)
    h2 = jnp.maximum(h2 + b2_ref[...], 0.0)                        # (H, TN) f32
    # Output unit has width 1: VPU multiply + sublane reduction (H=32 rows)
    # instead of a >99%-idle MXU pass.  Result is already lane-major.
    logits = jnp.sum(h2 * w3_ref[...], axis=0, keepdims=True) + b3_ref[...]

    is_cal = is_cal_ref[0]                                         # SMEM scalar

    @pl.when(is_cal != 0)
    def _():
        out_ref[...] = jax.nn.sigmoid(logits)

    @pl.when(is_cal == 0)
    def _():
        out_ref[...] = logits


# ---------------------------------------------------------------------------
# Tiling helpers
# ---------------------------------------------------------------------------
def _round_up(v: int, m: int) -> int:
    return ((v + m - 1) // m) * m


def _cdiv(a: int, b: int) -> int:
    return -(-a // b)


_MAX_TILE_N = 2048   # ~1 MiB of f32 activations per step; far below every
                     # generation's scoped-VMEM default (incl. v7x 64 MiB phys).


def _choose_batch_tile(n: int) -> int:
    """Lane-dense batch tiles.  Goals: (a) few grid steps (per-step fixed
    overhead ~0.35us dwarfs the sub-us compute of a narrow tile), (b) at least
    two steps once n >= 256 so both v7x TensorCores get work (negligible cost
    on 1-TC v5e/v6e), (c) balanced tiles capped at _MAX_TILE_N."""
    n128 = _round_up(max(n, 1), 128)
    if n128 <= 256:
        return 128
    num_tiles = max(2, _cdiv(n128, _MAX_TILE_N))
    return _round_up(_cdiv(n128, num_tiles), 128)


# ---------------------------------------------------------------------------
# Wrapper
# ---------------------------------------------------------------------------
def prepare_fused_params(w1, b1, w2, b2, w3, b3):
    """One-time (model-load) weight cast/layout — keep OFF the per-call path.

    torch nn.Linear layout: w1 (H, D), b1 (H,), w2 (H, H), b2 (H,), w3 (H,),
    b3 ().  Matmul weights become bf16 (MXU inputs); biases / output unit stay
    f32 with a trailing lane axis of 1 so they broadcast over the batch lanes.
    """
    h = w1.shape[0]
    return (jnp.asarray(w1, jnp.bfloat16),
            jnp.asarray(b1, jnp.float32).reshape(h, 1),
            jnp.asarray(w2, jnp.bfloat16),
            jnp.asarray(b2, jnp.float32).reshape(h, 1),
            jnp.asarray(w3, jnp.float32).reshape(h, 1),
            jnp.asarray(b3, jnp.float32).reshape(1, 1))


@jax.jit
def fused_classifier_forward(x, prepared, is_cal):
    """base_module(x) (+ optional sigmoid) via one pallas_call.

    x:        (N, D) float32 feature vectors (natural layout, no host staging
              unless the batch is ragged w.r.t. the tile).
    prepared: output of prepare_fused_params (bf16 W1/W2, f32 biases/w3/b3).
    is_cal:   (1,) int32 flag mirroring CalibratedLearner._is_cal.
    Returns (N,) float32 logits (flag=0) or calibrated probabilities (flag=1).

    Note: bf16 at the MXU inputs diverges from the f32 torch base_module by
    ~1e-2 relative per layer — a deliberate, documented tolerance.
    """
    w1p, b1p, w2p, b2p, w3p, b3p = prepared
    n, d = x.shape
    h = w1p.shape[0]
    tile_n = _choose_batch_tile(n)
    n_pad = _round_up(n, tile_n)

    if n_pad == n:
        # Tile-aligned batch: zero host-side staging; kernel casts to bf16.
        x_in = x
    else:
        # Ragged batch: single small staging pass — bf16 cast (half the f32
        # bytes) + batch-axis pad only.  No transpose, no feature padding.
        # Padded rows produce garbage logits that are sliced off below.
        x_in = jnp.zeros((n_pad, d), jnp.bfloat16).at[:n, :].set(
            x.astype(jnp.bfloat16))

    flag = jnp.asarray(is_cal, jnp.int32).reshape((1,))

    grid = (n_pad // tile_n,)
    out = pl.pallas_call(
        _base_mlp_kernel,
        out_shape=jax.ShapeDtypeStruct((1, n_pad), jnp.float32),
        grid_spec=pl.GridSpec(
            grid=grid,
            in_specs=[
                pl.BlockSpec((tile_n, d), lambda i: (i, 0)),   # x tile
                pl.BlockSpec((h, d), lambda i: (0, 0)),        # W1 (resident)
                pl.BlockSpec((h, 1), lambda i: (0, 0)),        # b1
                pl.BlockSpec((h, h), lambda i: (0, 0)),        # W2 (resident)
                pl.BlockSpec((h, 1), lambda i: (0, 0)),        # b2
                pl.BlockSpec((h, 1), lambda i: (0, 0)),        # w3 (output unit)
                pl.BlockSpec((1, 1), lambda i: (0, 0)),        # b3
                pl.BlockSpec(memory_space=pltpu.SMEM),         # is_cal flag
            ],
            out_specs=pl.BlockSpec((1, tile_n), lambda i: (0, i)),  # lane-dense
        ),
        compiler_params=pltpu.CompilerParams(
            dimension_semantics=("parallel",)),
    )(x_in, w1p, b1p, w2p, b2p, w3p, b3p, flag)
    return out[0, :n]


# APU_Learner keeps many ClassifierBlocks (wUU, PURR, aPNU(rho), nnPU, PN),
# but they all share the SAME base_module, so one kernel pass serves the dict.
_APU_BLOCK_NAMES = (
    "wUU", "PURR",
    *[f"aPNU_rho={i / 10:.1f}" for i in range(11)],
    "nnPU_u", "nnPU_u_te", "tr_pn", "te_pn",
)


def apu_learner_forward(x, prepared):
    """APU_Learner.forward(x) -> {block_name: base_module(x)} (shared logits)."""
    is_cal = jnp.zeros((1,), jnp.int32)          # APU blocks are raw logits
    logits = fused_classifier_forward(x, prepared, is_cal)
    return {name: logits for name in _APU_BLOCK_NAMES}


# ---------------------------------------------------------------------------
# Reference + demo
# ---------------------------------------------------------------------------
def _reference_forward(x, w1, b1, w2, b2, w3, b3, calibrated):
    """Plain-JAX reference of the same numeric path (bf16 MXU inputs, f32 math)."""
    f = lambda a: a.astype(jnp.bfloat16).astype(jnp.float32)
    h1 = jnp.maximum(f(x) @ f(w1).T + b1, 0.0)
    h2 = jnp.maximum(f(h1) @ f(w2).T + b2, 0.0)
    logits = h2 @ w3 + b3
    return jax.nn.sigmoid(logits) if calibrated else logits


def _init_params(key, d, h):
    k1, k2, k3, k4, k5, k6 = jax.random.split(key, 6)
    w1 = jax.random.normal(k1, (h, d), jnp.float32) / jnp.sqrt(d)
    b1 = 0.1 * jax.random.normal(k2, (h,), jnp.float32)
    w2 = jax.random.normal(k3, (h, h), jnp.float32) / jnp.sqrt(h)
    b2 = 0.1 * jax.random.normal(k4, (h,), jnp.float32)
    w3 = jax.random.normal(k5, (h,), jnp.float32) / jnp.sqrt(h)
    b3 = 0.1 * jax.random.normal(k6, (), jnp.float32)
    return w1, b1, w2, b2, w3, b3


if __name__ == "__main__":
    key = jax.random.PRNGKey(0)
    kx, kx2, kx3, kp = jax.random.split(key, 4)

    D, H = 32, 32                     # logical dims — NOT padded to 128 anymore
    raw_params = _init_params(kp, D, H)
    prepared = prepare_fused_params(*raw_params)   # one-time weight prep

    # Batch sizes covering: tiny (pads 16 -> one 128 tile), ragged (200 -> two
    # 128 tiles, staged), and tile-aligned multi-step (1024 -> two 512 tiles,
    # zero host staging).
    for kb, n in ((kx, 16), (kx2, 200), (kx3, 1024)):
        x = jax.random.normal(kb, (n, D), jnp.float32)
        for flag in (0, 1):          # 0: raw logits (APU blocks), 1: calibrated sigma
            is_cal = jnp.full((1,), flag, jnp.int32)
            y = jax.block_until_ready(
                fused_classifier_forward(x, prepared, is_cal))
            y_ref = _reference_forward(x, *raw_params, bool(flag))
            assert y.shape == (n,)
            assert jnp.allclose(y, y_ref, atol=5e-3, rtol=5e-3), "mismatch vs reference"

    # APU_Learner.forward: dict over all risk-estimator blocks (shared base net).
    x = jax.random.normal(kx, (16, D), jnp.float32)
    outs = apu_learner_forward(x, prepared)
    jax.block_until_ready(outs["PURR"])
    assert set(outs) == set(_APU_BLOCK_NAMES)

    # TODO(synk): fit()/calc_cal_weights() (training loops, dataloader building,
    # top-k spam calibration branch) are host-side control flow, not kernel work.
    print("KERNEL_OK")
</pallas_src>

<mosaic_0001>
module attributes {stable_mosaic.version = 11 : i64} {
  func.func @_base_mlp_kernel(%arg0: i32, %arg1: memref<128x32xbf16, #tpu.memory_space<vmem>>, %arg2: memref<32x32xbf16, #tpu.memory_space<vmem>>, %arg3: memref<32x1xf32, #tpu.memory_space<vmem>>, %arg4: memref<32x32xbf16, #tpu.memory_space<vmem>>, %arg5: memref<32x1xf32, #tpu.memory_space<vmem>>, %arg6: memref<32x1xf32, #tpu.memory_space<vmem>>, %arg7: memref<1x1xf32, #tpu.memory_space<vmem>>, %arg8: memref<1xi32, #tpu.memory_space<smem>>, %arg9: memref<1x128xf32, #tpu.memory_space<vmem>>) attributes {dimension_semantics = [#tpu.dimension_semantics<parallel>], iteration_bounds = array<i64: 1>, scalar_prefetch = 0 : i64, scratch_operands = 0 : i64, tpu.core_type = #tpu.core_type<tc>, window_params = [{transform_indices = @transform_0, window_bounds = array<i64: 128, 32>}, {pipeline_mode = #tpu.pipeline_mode<synchronous>, transform_indices = @transform_1, window_bounds = array<i64: 32, 32>}, {pipeline_mode = #tpu.pipeline_mode<synchronous>, transform_indices = @transform_2, window_bounds = array<i64: 32, 1>}, {pipeline_mode = #tpu.pipeline_mode<synchronous>, transform_indices = @transform_3, window_bounds = array<i64: 32, 32>}, {pipeline_mode = #tpu.pipeline_mode<synchronous>, transform_indices = @transform_4, window_bounds = array<i64: 32, 1>}, {pipeline_mode = #tpu.pipeline_mode<synchronous>, transform_indices = @transform_5, window_bounds = array<i64: 32, 1>}, {pipeline_mode = #tpu.pipeline_mode<synchronous>, transform_indices = @transform_6, window_bounds = array<i64: 1, 1>}, {transform_indices = @transform_7, window_bounds = array<i64: 1>}, {transform_indices = @transform_8, window_bounds = array<i64: 1, 128>}]} {
    %c0 = arith.constant 0 : index
    %c0_0 = arith.constant 0 : index
    %0 = vector.load %arg1[%c0, %c0_0] : memref<128x32xbf16, #tpu.memory_space<vmem>>, vector<128x32xbf16>
    %c0_1 = arith.constant 0 : index
    %c0_2 = arith.constant 0 : index
    %1 = vector.load %arg2[%c0_1, %c0_2] : memref<32x32xbf16, #tpu.memory_space<vmem>>, vector<32x32xbf16>
    %cst = arith.constant dense<0.000000e+00> : vector<32x128xf32>
    %2 = tpu.matmul %1, %0, %cst {dimension_numbers = #tpu.dot_dimension_numbers<[1], [1], [0], [0], [0, 0, 1, 0], [], []>} : vector<32x32xbf16>, vector<128x32xbf16>, vector<32x128xf32> -> vector<32x128xf32>
    %c0_3 = arith.constant 0 : index
    %c0_4 = arith.constant 0 : index
    %3 = vector.load %arg3[%c0_3, %c0_4] : memref<32x1xf32, #tpu.memory_space<vmem>>, vector<32x1xf32>
    %4 = vector.broadcast %3 : vector<32x1xf32> to vector<32x128xf32>
    %5 = arith.addf %2, %4 : vector<32x128xf32>
    %cst_5 = arith.constant 0.000000e+00 : f32
    %6 = vector.broadcast %cst_5 : f32 to vector<32x128xf32>
    %7 = arith.maximumf %5, %6 : vector<32x128xf32>
    %c0_6 = arith.constant 0 : index
    %c0_7 = arith.constant 0 : index
    %8 = vector.load %arg4[%c0_6, %c0_7] : memref<32x32xbf16, #tpu.memory_space<vmem>>, vector<32x32xbf16>
    %9 = arith.truncf %7 : vector<32x128xf32> to vector<32x128xbf16>
    %cst_8 = arith.constant dense<0.000000e+00> : vector<32x128xf32>
    %10 = tpu.matmul %8, %9, %cst_8 {dimension_numbers = #tpu.dot_dimension_numbers<[1], [0], [0], [1], [0, 0, 1, 1], [], []>} : vector<32x32xbf16>, vector<32x128xbf16>, vector<32x128xf32> -> vector<32x128xf32>
    %c0_9 = arith.constant 0 : index
    %c0_10 = arith.constant 0 : index
    %11 = vector.load %arg5[%c0_9, %c0_10] : memref<32x1xf32, #tpu.memory_space<vmem>>, vector<32x1xf32>
    %12 = vector.broadcast %11 : vector<32x1xf32> to vector<32x128xf32>
    %13 = arith.addf %10, %12 : vector<32x128xf32>
    %cst_11 = arith.constant 0.000000e+00 : f32
    %14 = vector.broadcast %cst_11 : f32 to vector<32x128xf32>
    %15 = arith.maximumf %13, %14 : vector<32x128xf32>
    %c0_12 = arith.constant 0 : index
    %c0_13 = arith.constant 0 : index
    %16 = vector.load %arg6[%c0_12, %c0_13] : memref<32x1xf32, #tpu.memory_space<vmem>>, vector<32x1xf32>
    %17 = vector.broadcast %16 : vector<32x1xf32> to vector<32x128xf32>
    %18 = arith.mulf %15, %17 : vector<32x128xf32>
    %cst_14 = arith.constant dense<0.000000e+00> : vector<128xf32>
    %19 = vector.multi_reduction <add>, %18, %cst_14 [0] : vector<32x128xf32> to vector<128xf32>
    %20 = vector.shape_cast %19 : vector<128xf32> to vector<1x128xf32>
    %c0_15 = arith.constant 0 : index
    %c0_16 = arith.constant 0 : index
    %21 = vector.load %arg7[%c0_15, %c0_16] : memref<1x1xf32, #tpu.memory_space<vmem>>, vector<1x1xf32>
    %22 = vector.broadcast %21 : vector<1x1xf32> to vector<1x128xf32>
    %23 = arith.addf %20, %22 : vector<1x128xf32>
    %c0_17 = arith.constant 0 : index
    %24 = memref.load %arg8[%c0_17] : memref<1xi32, #tpu.memory_space<smem>>
    %c0_i32 = arith.constant 0 : i32
    %25 = arith.cmpi ne, %24, %c0_i32 : i32
    %26 = arith.extui %25 : i1 to i32
    %c0_i32_18 = arith.constant 0 : i32
    %27 = arith.cmpi ne, %26, %c0_i32_18 : i32
    scf.if %27 {
      %31 = arith.negf %23 : vector<1x128xf32>
      %32 = math.exp %31 : vector<1x128xf32>
      %cst_21 = arith.constant 1.000000e+00 : f32
      %33 = vector.broadcast %cst_21 : f32 to vector<1x128xf32>
      %34 = arith.addf %33, %32 : vector<1x128xf32>
      %35 = arith.divf %33, %34 : vector<1x128xf32>
      %c0_22 = arith.constant 0 : index
      %c0_23 = arith.constant 0 : index
      %36 = vector.load %arg9[%c0_22, %c0_23] : memref<1x128xf32, #tpu.memory_space<vmem>>, vector<1x128xf32>
      tpu.vector_store %arg9[%c0_22, %c0_23], %35 {strides = array<i32>} : memref<1x128xf32, #tpu.memory_space<vmem>>, vector<1x128xf32>,
    } else {
    }
    %c0_i32_19 = arith.constant 0 : i32
    %28 = arith.cmpi eq, %24, %c0_i32_19 : i32
    %29 = arith.extui %28 : i1 to i32
    %c0_i32_20 = arith.constant 0 : i32
    %30 = arith.cmpi ne, %29, %c0_i32_20 : i32
    scf.if %30 {
      %c0_21 = arith.constant 0 : index
      %c0_22 = arith.constant 0 : index
      %31 = vector.load %arg9[%c0_21, %c0_22] : memref<1x128xf32, #tpu.memory_space<vmem>>, vector<1x128xf32>
      tpu.vector_store %arg9[%c0_21, %c0_22], %23 {strides = array<i32>} : memref<1x128xf32, #tpu.memory_space<vmem>>, vector<1x128xf32>,
    } else {
    }
    return
  }
  func.func @transform_0(%arg0: i32) -> (i32, i32) {
    %c0_i32 = arith.constant 0 : i32
    %c0_i32_0 = arith.constant 0 : i32
    return %arg0, %c0_i32 : i32, i32
  }
  func.func @transform_1(%arg0: i32) -> (i32, i32) {
    %c0_i32 = arith.constant 0 : i32
    %c0_i32_0 = arith.constant 0 : i32
    %c0_i32_1 = arith.constant 0 : i32
    return %c0_i32, %c0_i32_0 : i32, i32
  }
  func.func @transform_2(%arg0: i32) -> (i32, i32) {
    %c0_i32 = arith.constant 0 : i32
    %c0_i32_0 = arith.constant 0 : i32
    %c0_i32_1 = arith.constant 0 : i32
    return %c0_i32, %c0_i32_0 : i32, i32
  }
  func.func @transform_3(%arg0: i32) -> (i32, i32) {
    %c0_i32 = arith.constant 0 : i32
    %c0_i32_0 = arith.constant 0 : i32
    %c0_i32_1 = arith.constant 0 : i32
    return %c0_i32, %c0_i32_0 : i32, i32
  }
  func.func @transform_4(%arg0: i32) -> (i32, i32) {
    %c0_i32 = arith.constant 0 : i32
    %c0_i32_0 = arith.constant 0 : i32
    %c0_i32_1 = arith.constant 0 : i32
    return %c0_i32, %c0_i32_0 : i32, i32
  }
  func.func @transform_5(%arg0: i32) -> (i32, i32) {
    %c0_i32 = arith.constant 0 : i32
    %c0_i32_0 = arith.constant 0 : i32
    %c0_i32_1 = arith.constant 0 : i32
    return %c0_i32, %c0_i32_0 : i32, i32
  }
  func.func @transform_6(%arg0: i32) -> (i32, i32) {
    %c0_i32 = arith.constant 0 : i32
    %c0_i32_0 = arith.constant 0 : i32
    %c0_i32_1 = arith.constant 0 : i32
    return %c0_i32, %c0_i32_0 : i32, i32
  }
  func.func @transform_7(%arg0: i32) -> i32 {
    %c0_i32 = arith.constant 0 : i32
    %c0_i32_0 = arith.constant 0 : i32
    return %c0_i32 : i32
  }
  func.func @transform_8(%arg0: i32) -> (i32, i32) {
    %c0_i32 = arith.constant 0 : i32
    %c0_i32_0 = arith.constant 0 : i32
    return %c0_i32, %arg0 : i32, i32
  }
}

</mosaic_0001>

<bundles_post_ra>
// kernel: fused_classifier_forward.1
= control target key start
LH: loop header
LB: loop body
LE: loop exit
PB: predicated region body
PF: predicated region fallthrough
CT: control target
= control target key end

     0   :  { %vm127_vm0 = vcmask 261120   ;;  %v412_v6 = vmov 0   ;;  %s557_s0 = inlined_call_operand.vmem [shape: bf16[128,32], index: 0, kind: input, shape index: {}]   ;;  %s558_s7 = inlined_call_operand.<no memory space> [shape: s32[1], index: 7, kind: input, shape index: {}]   ;;  %s559_s8 = inlined_call_operand.vmem [shape: f32[1,128], index: 8, kind: output, shape index: {}]   ;;  %s560_s2 = inlined_call_operand.vmem [shape: f32[32,1], index: 2, kind: input, shape index: {}]   ;;  %s561_s4 = inlined_call_operand.vmem [shape: f32[32,1], index: 4, kind: input, shape index: {}]   ;;  %s562_s6 = inlined_call_operand.<no memory space> [shape: f32[1,1], index: 6, kind: input, shape index: {}]   ;;  %s563_s5 = inlined_call_operand.vmem [shape: f32[32,1], index: 5, kind: input, shape index: {}]   ;;  %s564_s1 = inlined_call_operand.vmem [shape: bf16[32,32], index: 1, kind: input, shape index: {}]   ;;  %s565_s3 = inlined_call_operand.vmem [shape: bf16[32,32], index: 3, kind: input, shape index: {}]  }
   0x1   :  { %v391_v0 = vld [vmem:[%s557_s0 + $0x38] sm:$0xff]  ;;  %v390_v2 = vld [vmem:[%s557_s0 + $0x30] sm:$0xff]  ;;  %v389_v5 = vld [vmem:[%s557_s0 + $0x28] sm:$0xff]  ;;  %405 = vset.pattern.permute.xlu0 %v412_v6  ;;  %406 = vset.pattern.permute.xlu1 %v412_v6  ;;  %v13_v16 = vstv %s562_s6  ;;  %p381_p0 = scmp.eq.s32.totalorder %s558_s7, 0 }
   0x2   :  { %v156_v1 = vsel %vm127_vm0, %v391_v0, 0  ;;  %v153_v3 = vsel %vm127_vm0, %v390_v2, 0  ;;  %v55_v4 = vld [vmem:[%s560_s2 + $0x10] sm:$0xff]  ;;  %407 = vset.pattern.permute.xlu2 %v412_v6  ;;  %v150_v7 = vsel %vm127_vm0, %v389_v5, 0  ;;  %v56_v8 = vld [vmem:[%s560_s2 + $0x18] sm:$0xff]  ;;  %v388_v9 = vld [vmem:[%s557_s0 + $0x20] sm:$0xff] }
   0x3   :  { %396 = vmatpush.bf16.xpose.msra.mxu2 %v156_v1  ;;  %158 = vmatpush.bf16.xpose.msra.mxu0 %v156_v1  ;;  %v147_v10 = vsel %vm127_vm0, %v388_v9, 0  ;;  %v53_v11 = vld [vmem:[%s560_s2] sm:$0xff]  ;;  %v387_v12 = vld [vmem:[%s557_s0 + $0x18] sm:$0xff]  ;;  %v189_v14 = vld [vmem:[%s561_s4 + $0x10] sm:$0xff]  ;;  %14 = vst [vmem:[#allocation2] sm:$0x1] %v13_v16 }
   0x4   :  { %69 = vperm.xlu0 %405, %v55_v4   ;;  %59 = vperm.xlu1 %406, %v53_v11   ;;  %v144_v13 = vsel %vm127_vm0, %v387_v12, 0  ;;  %v54_v15 = vld [vmem:[%s560_s2 + $0x8] sm:$0xff]  ;;  %v386_v17 = vld [vmem:[%s557_s0 + $0x10] sm:$0xff]  ;;  %v190_v20 = vld [vmem:[%s561_s4 + $0x18] sm:$0xff] }
   0x5   :  { %v141_v18 = vsel %vm127_vm0, %v386_v17, 0  ;;  %v251_v19 = vld [vmem:[%s563_s5 + $0x8] sm:$0xff]  ;;  %v252_v24 = vld [vmem:[%s563_s5 + $0x10] sm:$0xff]  ;;  %v384_v25 = vld [vmem:[%s557_s0] sm:$0xff] }
   0x6   :  { %v385_v21 = vld [vmem:[%s557_s0 + $0x8] sm:$0xff]  ;;  %v135_v26 = vsel %vm127_vm0, %v384_v25, 0  ;;  %v392_v28 = vld [vmem:[%s564_s1] sm:$0xff]  ;;  %v253_v51 = vld [vmem:[%s563_s5 + $0x18] sm:$0xff] }
   0x7   :  { %v138_v22 = vsel %vm127_vm0, %v385_v21, 0  ;;  %v393_v27 = vld [vmem:[%s564_s1 + $0x8] sm:$0xff]  ;;  %v187_v29 = vld [vmem:[%s561_s4] sm:$0xff] }
   0x8   :  { %193 = vperm.xlu2 %407, %v187_v29   ;;  %v188_v35 = vld [vmem:[%s561_s4 + $0x8] sm:$0xff]  ;;  %v250_v45 = vld [vmem:[%s563_s5] sm:$0xff] }
   0x9   :  { %v394_v50 = vld [vmem:[%s565_s3] sm:$0xff]  ;;  %v395_v52 = vld [vmem:[%s565_s3 + $0x8] sm:$0xff] }
   0xa   :  { %v287_v23 = vld [vmem:[#allocation2] sm:$0x1] }
   0xb   :  { %397 = vmatpush.bf16.xpose.msra.mxu2 %v153_v3  ;;  %159 = vmatpush.bf16.xpose.msra.mxu0 %v153_v3 }
   0xc   :  { %74 = vperm.xlu0 %405, %v56_v8   ;;  %64 = vperm.xlu1 %406, %v54_v15  }
  0x10   :  { %198 = vperm.xlu2 %407, %v188_v35  }
  0x13   :  { %398 = vmatpush.bf16.xpose.msra.mxu2 %v150_v7  ;;  %160 = vmatpush.bf16.xpose.msra.mxu0 %v150_v7 }
  0x14   :  { %203 = vperm.xlu0 %405, %v189_v14   ;;  %208 = vperm.xlu1 %406, %v190_v20  }
  0x18   :  { %256 = vperm.xlu2 %407, %v250_v45  }
  0x1b   :  { %399 = vmatpush.bf16.xpose.msra.mxu2 %v147_v10  ;;  %161 = vmatpush.bf16.xpose.msra.mxu0 %v147_v10 }
  0x1c   :  { %261 = vperm.xlu0 %405, %v251_v19   ;;  %266 = vperm.xlu1 %406, %v252_v24  }
  0x20   :  { %271 = vperm.xlu2 %407, %v253_v51  }
  0x23   :  { %400 = vmatpush.bf16.xpose.msra.mxu2 %v144_v13  ;;  %162 = vmatpush.bf16.xpose.msra.mxu0 %v144_v13 }
  0x24   :  { %290 = vperm.xlu0 %405, %v287_v23  }
  0x2b   :  { %401 = vmatpush.bf16.xpose.msra.mxu2 %v141_v18  ;;  %163 = vmatpush.bf16.xpose.msra.mxu0 %v141_v18 }
  0x33   :  { %402 = vmatpush.bf16.xpose.msra.mxu2 %v138_v22  ;;  %164 = vmatpush.bf16.xpose.msra.mxu0 %v138_v22 }
  0x3b   :  { %403 = vmatpush.bf16.xpose.msra.mxu2 %v135_v26  ;;  %165 = vmatpush.bf16.xpose.msra.mxu0 %v135_v26 }
  0x42   :  { %370 = vmatmul.msk.bf16.vlgmr.msra.gmra.mxu2 %vm127_vm0, %v393_v27  ;;  %369 = vmatmul.msk.bf16.vlgmr.msra.gmra.mxu0 %vm127_vm0, %v392_v28 }
  0x62   :  { %v194_v53 = vpop.permute.xlu2 %193 }
  0x6a   :  { %v199_v55 = vpop.permute.xlu2 %198 }
  0x72   :  { %v257_v63 = vpop.permute.xlu2 %256 }
  0x76   :  { %v70_v31 = vpop.permute.xlu0 %69  ;;  %v60_v32 = vpop.permute.xlu1 %59 }
  0x7a   :  { %v272_v12 = vpop.permute.xlu2 %271 }
  0x7e   :  { %v75_v36 = vpop.permute.xlu0 %74  ;;  %v65_v38 = vpop.permute.xlu1 %64 }
  0x86   :  { %v204_v57 = vpop.permute.xlu0 %203  ;;  %v209_v58 = vpop.permute.xlu1 %208 }
  0x8e   :  { %v262_v3 = vpop.permute.xlu0 %261  ;;  %v267_v5 = vpop.permute.xlu1 %266 }
  0x96   :  { %v291_v20 = vpop.permute.xlu0 %290 }
  0x97   :  { %v293_v22 = vperm.slane %v291_v20, 0 }
  0xbf   :  { %v167_v30 = vpop.f32.mrf.mxu0 }
  0xc0   :  { %v168_v40 = vadd.f32 %v167_v30, %v60_v32 }
  0xc2   :  { %v177_v46 = vmax.f32 %v168_v40, 0.0 }
  0xc5   :  { %v172_v33 = vpop.f32.mrf.mxu2 }
  0xc6   :  { %v173_v37 = vadd.f32 %v172_v33, %v70_v31 }
  0xc7   :  { %v169_v34 = vpop.f32.mrf.mxu0 }
  0xc8   :  { %v170_v41 = vadd.f32 %v169_v34, %v65_v38  ;;  %v179_v43 = vmax.f32 %v173_v37, 0.0 }
  0xca   :  { %v178_v47 = vmax.f32 %v170_v41, 0.0 }
  0xcc   :  { %v185_v49 = vpack.c.bf16 %v178_v47, %v177_v46 }
  0xcd   :  { %v174_v39 = vpop.f32.mrf.mxu2 }
  0xce   :  { %v175_v42 = vadd.f32 %v174_v39, %v75_v36 }
  0xd0   :  { %v180_v44 = vmax.f32 %v175_v42, 0.0 }
  0xd2   :  { %v186_v48 = vpack.c.bf16 %v180_v44, %v179_v43 }
  0xd4   :  { %233 = vmatpush.bf16.msra.mxu1 %v186_v48 }
  0xd8   :  { %234 = vmatpush.bf16.msra.mxu1 %v185_v49 }
  0xdb   :  { %379 = vmatmul.msk.bf16.vlgmr.msra.gmra.mxu1 %vm127_vm0, %v394_v50 }
  0xeb   :  { %380 = vmatmul.msk.bf16.gmra.mxu1 %vm127_vm0, %v395_v52 }
 0x158   :  { %v236_v54 = vpop.f32.mrf.mxu1 }
 0x159   :  { %v237_v61 = vadd.f32 %v236_v54, %v194_v53 }
 0x15b   :  { %v246_v1 = vmax.f32 %v237_v61, 0.0 }
 0x15d   :  { %v274_v7 = vmul.f32 %v257_v63, %v246_v1 }
 0x160   :  { %v238_v56 = vpop.f32.mrf.mxu1 }
 0x161   :  { %v239_v59 = vadd.f32 %v238_v56, %v199_v55 }
 0x163   :  { %v247_v0 = vmax.f32 %v239_v59, 0.0 }
 0x165   :  { %v275_v4 = vmul.f32 %v262_v3, %v247_v0 }
 0x167   :  { %v278_v10 = vadd.f32 %v275_v4, %v274_v7 }
 0x168   :  { %v241_v60 = vpop.f32.mrf.mxu1 }
 0x169   :  { %v242_v62 = vadd.f32 %v241_v60, %v204_v57 }
 0x16b   :  { %v248_v2 = vmax.f32 %v242_v62, 0.0 }
 0x16d   :  { %v276_v8 = vmul.f32 %v267_v5, %v248_v2 }
 0x16f   :  { %v279_v13 = vadd.f32 %v278_v10, %v276_v8 }
 0x170   :  { %v243_v6 = vpop.f32.mrf.mxu1 }
 0x171   :  { %v244_v9 = vadd.f32 %v243_v6, %v209_v58 }
 0x173   :  { %v249_v11 = vmax.f32 %v244_v9, 0.0 }
 0x175   :  { %v277_v14 = vmul.f32 %v272_v12, %v249_v11 }
 0x177   :  { %v280_v15 = vadd.f32 %v279_v13, %v277_v14 }
 0x179   :  { %v281_v16 = vrot.slane %v280_v15, 4 }
 0x17b   :  { %v282_v17 = vadd.f32 %v281_v16, %v280_v15 }
 0x17d   :  { %v283_v18 = vrot.slane %v282_v17, 2 }
 0x17f   :  { %v284_v19 = vadd.f32 %v283_v18, %v282_v17 }
 0x181   :  { %v285_v21 = vrot.slane %v284_v19, 1  ;;  %299 = sbr.rel (%p381_p0) target bundleno = 420 (0x1a4), region = 37 }
 0x183   :  { %v286_v23 = vadd.f32 %v285_v21, %v284_v19 }
 0x185   :  { %v294_v24 = vadd.f32 %v293_v22, %v286_v23 }
 0x187   :  { %v382_v25 = vmul.f32 -1.442695, %v294_v24 }
 0x189   :  { %408 = vpow2.f32 %v382_v25 }
 0x18f   :  { %v409_v26 = vpop.eup %408 }
 0x190   :  { %v303_v27 = vadd.f32 1.0, %v409_v26 }
 0x192   :  { %410 = vrcp.f32 %v303_v27  ;;  %v315_v30 = vand.u32 2147483648, %v303_v27  ;;  %vm309_vm1 = vweird.f32 %v303_v27  ;;  %v313_v32 = vand.u32 2147483647, %v303_v27 }
 0x194   :  { %v316_v34 = vor.u32 1.1754944e-38, %v315_v30  ;;  %vm314_vm4 = vcmp.eq.f32.partialorder %v313_v32, 8.507059e+37 }
 0x198   :  { %v411_v28 = vpop.eup %410 }
 0x199   :  { %v305_v29 = vmul.f32 %v411_v28, %v303_v27  ;;  %vm310_vm2 = vweird.f32 %v411_v28 }
 0x19a   :  { %vm311_vm3 = vmor %vm309_vm1, %vm310_vm2 }
 0x19b   :  { %v306_v31 = vsub.f32 1.0, %v305_v29 }
 0x19d   :  { %v307_v33 = vmul.f32 %v411_v28, %v306_v31 }
 0x19f   :  { %v308_v35 = vadd.f32 %v411_v28, %v307_v33 }
 0x1a1   :  { %v312_v36 = vsel %vm311_vm3, %v411_v28, %v308_v35 }
 0x1a2   :  { %v317_v37 = vsel %vm314_vm4, %v316_v34, %v312_v36 }
 0x1a3   :  { %319 = vst [vmem:[%s559_s8] sm:$0x1] %v317_v37 }
 0x1a4 PF:  { %p383_p1 = scmp.ne.s32.totalorder %s558_s7, 0 }
 0x1a6   :  { %323 = sbr.rel (%p383_p1) target bundleno = 428 (0x1ac), region = 41 }
 0x1ab   :  { %324 = vst [vmem:[%s559_s8] sm:$0x1] %v294_v24 }
 0x1ac PF:  {}

</bundles_post_ra>
